<compile_context>
chip_gen: v5e
topology: v5e:2x2
jax: 0.10.0
libtpu: 0.0.40
codegen_flags: <defaults>
</compile_context>

<pallas_src>
import jax
import jax.numpy as jnp
from jax.experimental import pallas as pl
from jax.experimental.pallas import tpu as pltpu

HIDDEN1 = 512
HIDDEN2 = 256


def _mlp_kernel(x_ref, w1_ref, b1_ref, w2_ref, b2_ref, w3_ref, b3_ref, o_ref):
    # fc1: cast x to bf16 in-kernel (VPU pack, hidden under the MXU), bf16 MXU
    # matmul with f32 accumulation; bias + ReLU in f32.
    x = x_ref[...].astype(jnp.bfloat16)
    h1 = jnp.dot(x, w1_ref[...], preferred_element_type=jnp.float32)
    h1 = jnp.maximum(h1 + b1_ref[...], 0.0)
    # fc2: activation back to bf16 for the MXU, accumulate in f32.
    h2 = jnp.dot(h1.astype(jnp.bfloat16), w2_ref[...],
                 preferred_element_type=jnp.float32)
    h2 = jnp.maximum(h2 + b2_ref[...], 0.0)
    # fc3 (out width 1): VPU multiply + XLU lane reduce -- keeps the MXU free
    # for fc1/fc2 of the next tile.  b3 is an SMEM scalar.
    logits = jnp.sum(h2 * w3_ref[...], axis=-1, keepdims=True) + b3_ref[0]
    o_ref[...] = jax.nn.sigmoid(logits)


def pack_params(params):
    """One-time repack: bf16 matmul weights, fc3 weight as a (1, HIDDEN2) row,
    fc3 bias as a 1-element SMEM scalar."""
    w1, b1, w2, b2, w3, b3 = params
    return (
        w1.astype(jnp.bfloat16),
        b1.reshape(1, HIDDEN1).astype(jnp.float32),
        w2.astype(jnp.bfloat16),
        b2.reshape(1, HIDDEN2).astype(jnp.float32),
        w3.reshape(1, HIDDEN2).astype(jnp.float32),   # (256,1) -> (1,256) row
        b3.reshape(1).astype(jnp.float32),            # SMEM scalar
    )


def _round8(n):
    return max(8, -(-n // 8) * 8)


def _default_tile_cap():
    # v5e's scoped-VMEM default is 16 MiB -> cap TB at 1024 (~5-6 MiB live).
    # v6e/v7x scoped default is 32 MiB -> TB=2048 (~10-11 MiB live) fits.
    try:
        kind = jax.devices()[0].device_kind.lower()
    except Exception:
        kind = ""
    return 1024 if "v5" in kind else 2048


def anomaly_classifier_forward(x, packed_params, *, tile_b=None):
    """x: (B, input_dim) float32.  Returns (B, 1) float32 in (0, 1)."""
    w1, b1, w2, b2, w3_row, b3 = packed_params
    B, D = x.shape

    cap = _default_tile_cap() if tile_b is None else tile_b
    # Batch tile: multiple of 8 (sublane rule); keep >= 2 grid steps whenever
    # the batch allows it so ("parallel",) can use both TensorCores on v7x.
    TB = max(8, min(cap, _round8(pl.cdiv(B, 2))))
    grid = (pl.cdiv(B, TB),)

    resident = lambda i: (0, 0)  # same block every step -> stays VMEM-resident

    out = pl.pallas_call(
        _mlp_kernel,
        out_shape=jax.ShapeDtypeStruct((B, 1), jnp.float32),
        grid=grid,
        in_specs=[
            pl.BlockSpec((TB, D), lambda i: (i, 0)),            # x tile (f32)
            pl.BlockSpec((D, HIDDEN1), resident),                # w1 (bf16)
            pl.BlockSpec((1, HIDDEN1), resident),                # b1 (f32)
            pl.BlockSpec((HIDDEN1, HIDDEN2), resident),          # w2 (bf16)
            pl.BlockSpec((1, HIDDEN2), resident),                # b2 (f32)
            pl.BlockSpec((1, HIDDEN2), resident),                # w3 row (f32)
            pl.BlockSpec(memory_space=pltpu.MemorySpace.SMEM),   # b3 scalar
        ],
        out_specs=pl.BlockSpec((TB, 1), lambda i: (i, 0)),
        compiler_params=pltpu.CompilerParams(
            dimension_semantics=("parallel",)),                  # megacore on v7x
    )(x, w1, b1, w2, b2, w3_row, b3)
    return out


def init_params(key, input_dim):
    """Deterministic synthetic parameters matching nn.Linear shapes.

    PyTorch Linear(in, out) has weight (out, in) and bias (out,); we store the
    transpose (in, out) and biases as (1, out) for 2-D broadcasting.
    """
    ks = jax.random.split(key, 6)

    def linear(kw, kb, fan_in, fan_out):
        bound = 1.0 / jnp.sqrt(fan_in)
        w = jax.random.uniform(kw, (fan_in, fan_out), jnp.float32, -bound, bound)
        b = jax.random.uniform(kb, (1, fan_out), jnp.float32, -bound, bound)
        return w, b

    w1, b1 = linear(ks[0], ks[1], input_dim, HIDDEN1)
    w2, b2 = linear(ks[2], ks[3], HIDDEN1, HIDDEN2)
    w3, b3 = linear(ks[4], ks[5], HIDDEN2, 1)
    return (w1, b1, w2, b2, w3, b3)


if __name__ == "__main__":
    key = jax.random.PRNGKey(0)
    k_x, k_p = jax.random.split(key)

    batch = 8
    input_dim = 32
    x = jax.random.normal(k_x, (batch, input_dim), dtype=jnp.float32)
    params = init_params(k_p, input_dim)
    packed = pack_params(params)

    out = anomaly_classifier_forward(x, packed)
    out = jax.block_until_ready(out)

    # pure-JAX f32 reference (dropout == identity in eval mode)
    w1, b1, w2, b2, w3, b3 = params
    h = jnp.maximum(x @ w1 + b1, 0.0)
    h = jnp.maximum(h @ w2 + b2, 0.0)
    ref = jax.nn.sigmoid(h @ w3 + b3)

    assert out.shape == (batch, 1)
    # bf16 weights/activations vs f32 reference -> relaxed tolerance.
    assert jnp.allclose(out, ref, atol=2e-2, rtol=2e-2), (
        f"max abs err {jnp.max(jnp.abs(out - ref))}")

    print("KERNEL_OK")
</pallas_src>

<mosaic_0001>
module attributes {stable_mosaic.version = 11 : i64} {
  func.func @_mlp_kernel(%arg0: i32, %arg1: memref<8x32xf32, #tpu.memory_space<vmem>>, %arg2: memref<32x512xbf16, #tpu.memory_space<vmem>>, %arg3: memref<1x512xf32, #tpu.memory_space<vmem>>, %arg4: memref<512x256xbf16, #tpu.memory_space<vmem>>, %arg5: memref<1x256xf32, #tpu.memory_space<vmem>>, %arg6: memref<1x256xf32, #tpu.memory_space<vmem>>, %arg7: memref<1xf32, #tpu.memory_space<smem>>, %arg8: memref<8x1xf32, #tpu.memory_space<vmem>>) attributes {dimension_semantics = [#tpu.dimension_semantics<parallel>], iteration_bounds = array<i64: 1>, scalar_prefetch = 0 : i64, scratch_operands = 0 : i64, tpu.core_type = #tpu.core_type<tc>, window_params = [{transform_indices = @transform_0, window_bounds = array<i64: 8, 32>}, {pipeline_mode = #tpu.pipeline_mode<synchronous>, transform_indices = @transform_1, window_bounds = array<i64: 32, 512>}, {pipeline_mode = #tpu.pipeline_mode<synchronous>, transform_indices = @transform_2, window_bounds = array<i64: 1, 512>}, {pipeline_mode = #tpu.pipeline_mode<synchronous>, transform_indices = @transform_3, window_bounds = array<i64: 512, 256>}, {pipeline_mode = #tpu.pipeline_mode<synchronous>, transform_indices = @transform_4, window_bounds = array<i64: 1, 256>}, {pipeline_mode = #tpu.pipeline_mode<synchronous>, transform_indices = @transform_5, window_bounds = array<i64: 1, 256>}, {transform_indices = @transform_6, window_bounds = array<i64: 1>}, {transform_indices = @transform_7, window_bounds = array<i64: 8, 1>}]} {
    %c0 = arith.constant 0 : index
    %c0_0 = arith.constant 0 : index
    %0 = vector.load %arg1[%c0, %c0_0] : memref<8x32xf32, #tpu.memory_space<vmem>>, vector<8x32xf32>
    %1 = arith.truncf %0 : vector<8x32xf32> to vector<8x32xbf16>
    %c0_1 = arith.constant 0 : index
    %c0_2 = arith.constant 0 : index
    %2 = vector.load %arg2[%c0_1, %c0_2] : memref<32x512xbf16, #tpu.memory_space<vmem>>, vector<32x512xbf16>
    %cst = arith.constant dense<0.000000e+00> : vector<8x512xf32>
    %3 = tpu.matmul %1, %2, %cst {dimension_numbers = #tpu.dot_dimension_numbers<[1], [0], [0], [1], [0, 0, 1, 1], [], []>} : vector<8x32xbf16>, vector<32x512xbf16>, vector<8x512xf32> -> vector<8x512xf32>
    %c0_3 = arith.constant 0 : index
    %c0_4 = arith.constant 0 : index
    %4 = vector.load %arg3[%c0_3, %c0_4] : memref<1x512xf32, #tpu.memory_space<vmem>>, vector<1x512xf32>
    %5 = vector.broadcast %4 : vector<1x512xf32> to vector<8x512xf32>
    %6 = arith.addf %3, %5 : vector<8x512xf32>
    %cst_5 = arith.constant 0.000000e+00 : f32
    %7 = vector.broadcast %cst_5 : f32 to vector<8x512xf32>
    %8 = arith.maximumf %6, %7 : vector<8x512xf32>
    %9 = arith.truncf %8 : vector<8x512xf32> to vector<8x512xbf16>
    %c0_6 = arith.constant 0 : index
    %c0_7 = arith.constant 0 : index
    %10 = vector.load %arg4[%c0_6, %c0_7] : memref<512x256xbf16, #tpu.memory_space<vmem>>, vector<512x256xbf16>
    %cst_8 = arith.constant dense<0.000000e+00> : vector<8x256xf32>
    %11 = tpu.matmul %9, %10, %cst_8 {dimension_numbers = #tpu.dot_dimension_numbers<[1], [0], [0], [1], [0, 0, 1, 1], [], []>} : vector<8x512xbf16>, vector<512x256xbf16>, vector<8x256xf32> -> vector<8x256xf32>
    %c0_9 = arith.constant 0 : index
    %c0_10 = arith.constant 0 : index
    %12 = vector.load %arg5[%c0_9, %c0_10] : memref<1x256xf32, #tpu.memory_space<vmem>>, vector<1x256xf32>
    %13 = vector.broadcast %12 : vector<1x256xf32> to vector<8x256xf32>
    %14 = arith.addf %11, %13 : vector<8x256xf32>
    %cst_11 = arith.constant 0.000000e+00 : f32
    %15 = vector.broadcast %cst_11 : f32 to vector<8x256xf32>
    %16 = arith.maximumf %14, %15 : vector<8x256xf32>
    %c0_12 = arith.constant 0 : index
    %c0_13 = arith.constant 0 : index
    %17 = vector.load %arg6[%c0_12, %c0_13] : memref<1x256xf32, #tpu.memory_space<vmem>>, vector<1x256xf32>
    %18 = vector.broadcast %17 : vector<1x256xf32> to vector<8x256xf32>
    %19 = arith.mulf %16, %18 : vector<8x256xf32>
    %cst_14 = arith.constant dense<0.000000e+00> : vector<8xf32>
    %20 = vector.multi_reduction <add>, %19, %cst_14 [1] : vector<8x256xf32> to vector<8xf32>
    %21 = vector.shape_cast %20 : vector<8xf32> to vector<8x1xf32>
    %c0_15 = arith.constant 0 : index
    %22 = memref.load %arg7[%c0_15] : memref<1xf32, #tpu.memory_space<smem>>
    %23 = vector.broadcast %22 : f32 to vector<8x1xf32>
    %24 = arith.addf %21, %23 : vector<8x1xf32>
    %25 = arith.negf %24 : vector<8x1xf32>
    %26 = math.exp %25 : vector<8x1xf32>
    %cst_16 = arith.constant 1.000000e+00 : f32
    %27 = vector.broadcast %cst_16 : f32 to vector<8x1xf32>
    %28 = arith.addf %27, %26 : vector<8x1xf32>
    %29 = arith.divf %27, %28 : vector<8x1xf32>
    %c0_17 = arith.constant 0 : index
    %c0_18 = arith.constant 0 : index
    %30 = vector.load %arg8[%c0_17, %c0_18] : memref<8x1xf32, #tpu.memory_space<vmem>>, vector<8x1xf32>
    tpu.vector_store %arg8[%c0_17, %c0_18], %29 {strides = array<i32>} : memref<8x1xf32, #tpu.memory_space<vmem>>, vector<8x1xf32>,
    return
  }
  func.func @transform_0(%arg0: i32) -> (i32, i32) {
    %c0_i32 = arith.constant 0 : i32
    %c0_i32_0 = arith.constant 0 : i32
    return %arg0, %c0_i32 : i32, i32
  }
  func.func @transform_1(%arg0: i32) -> (i32, i32) {
    %c0_i32 = arith.constant 0 : i32
    %c0_i32_0 = arith.constant 0 : i32
    %c0_i32_1 = arith.constant 0 : i32
    return %c0_i32, %c0_i32_0 : i32, i32
  }
  func.func @transform_2(%arg0: i32) -> (i32, i32) {
    %c0_i32 = arith.constant 0 : i32
    %c0_i32_0 = arith.constant 0 : i32
    %c0_i32_1 = arith.constant 0 : i32
    return %c0_i32, %c0_i32_0 : i32, i32
  }
  func.func @transform_3(%arg0: i32) -> (i32, i32) {
    %c0_i32 = arith.constant 0 : i32
    %c0_i32_0 = arith.constant 0 : i32
    %c0_i32_1 = arith.constant 0 : i32
    return %c0_i32, %c0_i32_0 : i32, i32
  }
  func.func @transform_4(%arg0: i32) -> (i32, i32) {
    %c0_i32 = arith.constant 0 : i32
    %c0_i32_0 = arith.constant 0 : i32
    %c0_i32_1 = arith.constant 0 : i32
    return %c0_i32, %c0_i32_0 : i32, i32
  }
  func.func @transform_5(%arg0: i32) -> (i32, i32) {
    %c0_i32 = arith.constant 0 : i32
    %c0_i32_0 = arith.constant 0 : i32
    %c0_i32_1 = arith.constant 0 : i32
    return %c0_i32, %c0_i32_0 : i32, i32
  }
  func.func @transform_6(%arg0: i32) -> i32 {
    %c0_i32 = arith.constant 0 : i32
    %c0_i32_0 = arith.constant 0 : i32
    return %c0_i32 : i32
  }
  func.func @transform_7(%arg0: i32) -> (i32, i32) {
    %c0_i32 = arith.constant 0 : i32
    %c0_i32_0 = arith.constant 0 : i32
    return %arg0, %c0_i32 : i32, i32
  }
}

</mosaic_0001>

<bundles_post_ra>
// kernel: tpu_custom_call.1
= control target key start
LH: loop header
LB: loop body
LE: loop exit
PB: predicated region body
PF: predicated region fallthrough
CT: control target
= control target key end

     0   :  { %13 = vsyncpa [#allocation4], 0  ;;  %s1304_s0 = inlined_call_operand.hbm [shape: f32[8,32], index: 0, kind: input, shape index: {}]   ;;  %s1305_s1 = inlined_call_operand.hbm [shape: bf16[32,512], index: 1, kind: input, shape index: {}]   ;;  %s1306_s2 = inlined_call_operand.hbm [shape: f32[1,512], index: 2, kind: input, shape index: {}]   ;;  %s1307_s3 = inlined_call_operand.hbm [shape: bf16[512,256], index: 3, kind: input, shape index: {}]   ;;  %s1308_s4 = inlined_call_operand.vmem [shape: f32[1,256], index: 4, kind: input, shape index: {}]   ;;  %s1309_s5 = inlined_call_operand.vmem [shape: f32[1,256], index: 5, kind: input, shape index: {}]   ;;  %s1310_s6 = inlined_call_operand.<no memory space> [shape: f32[1], index: 6, kind: input, shape index: {}]   ;;  %s1311_s7 = inlined_call_operand.vmem [shape: f32[8,1], index: 7, kind: output, shape index: {}]  }
   0x1   :  { %14 = vsyncpa [#allocation6], 0  ;;  %s31_s26 = sshll.u32 %s1305_s1, 4  ;;  %s32_s26 = int_to_ptr.hbm [resolvable:$true] %s31_s26 }
   0x2   :  { %15 = vsyncpa [#allocation9], 0  ;;  %s1228_s27 = smov [#allocation5]   ;;  %s21_s8 = sshll.u32 %s1304_s0, 4  ;;  %s22_s8 = int_to_ptr.hbm [resolvable:$true] %s21_s8 }
   0x3   :  { %s33_s28 = sshll.u32 %s1228_s27, 4  ;;  %s1229_s9 = smov 256   ;;  %s34_s28 = int_to_ptr.vmem [resolvable:$true] %s33_s28 }
   0x4   :  { %s1230_s10 = smov 16   ;;  %s1231_s11 = smov [#allocation3]  }
   0x5   :  { %39 = dma.hbm_to_vmem [thread:$0]  %s32_s26, 1024, %s34_s28, [#allocation6], %s1229_s9, %s1229_s9, %s1230_s10  }
   0x6   :  { %s23_s12 = sshll.u32 %s1231_s11, 4  ;;  %s45_s15 = sshll.u32 %s1306_s2, 4  ;;  %s24_s12 = int_to_ptr.vmem [resolvable:$true] %s23_s12  ;;  %s46_s15 = int_to_ptr.hbm [resolvable:$true] %s45_s15 }
   0x7   :  { %26 = dma.hbm_to_vmem [thread:$0]  %s22_s8, 128, %s24_s12, [#allocation4]  }
   0x8   :  { %s55_s17 = sshll.u32 %s1307_s3, 4  ;;  %s1232_s18 = smov [#allocation7]   ;;  %s56_s17 = int_to_ptr.hbm [resolvable:$true] %s55_s17 }
   0x9   :  { %s47_s19 = sshll.u32 %s1232_s18, 4  ;;  %s1233_s0 = smov [#allocation8]   ;;  %s48_s19 = int_to_ptr.vmem [resolvable:$true] %s47_s19 }
   0xa   :  { %50 = dma.hbm_to_vmem [thread:$0]  %s46_s15, 64, %s48_s19, [#allocation6]  }
   0xb   :  { %s57_s20 = sshll.u32 %s1233_s0, 4  ;;  %s1234_s21 = smov 128   ;;  %s58_s20 = int_to_ptr.vmem [resolvable:$true] %s57_s20 }
   0xc   :  { %s1235_s22 = smov 8  }
   0xd   :  { %63 = dma.hbm_to_vmem [thread:$0]  %s56_s17, 8192, %s58_s20, [#allocation9], %s1234_s21, %s1234_s21, %s1235_s22  }
   0xe   :  { %1222 = dma.done.wait [#allocation4], 128  }
   0xf   :  { %1223 = vsyncadd [#allocation4], 4294967168 }
  0x10   :  { %1224 = dma.done.wait [#allocation6], 1088  }
  0x11   :  { %1225 = vsyncadd [#allocation6], 4294966208 }
  0x12   :  { %1226 = dma.done.wait [#allocation9], 8192  }
  0x13   :  { %1227 = vsyncadd [#allocation9], 4294959104  ;;  %v767_v0 = vld [vmem:[#allocation5 + $0x20] sm:$0xf]  ;;  %v1048_v1 = vld [vmem:[#allocation5 + $0x2c] sm:$0xf0] }
  0x14   :  { %v1046_v2 = vld [vmem:[#allocation5 + $0x24] sm:$0xf]  ;;  %v768_v3 = vor.u32 %v1048_v1, %v767_v0  ;;  %v769_v4 = vld [vmem:[#allocation5 + $0x30] sm:$0xf0]  ;;  %v775_v5 = vld [vmem:[#allocation5 + $0x28] sm:$0xf] }
  0x15   :  { %v1049_v6 = vld [vmem:[#allocation5 + $0x34] sm:$0xf0]  ;;  %v772_v7 = vor.u32 %v1046_v2, %v769_v4  ;;  %v1047_v9 = vld [vmem:[#allocation5 + $0x2c] sm:$0xf]  ;;  %v777_v10 = vld [vmem:[#allocation5 + $0x38] sm:$0xf0] }
  0x16   :  { %v776_v8 = vor.u32 %v1049_v6, %v775_v5  ;;  %v751_v11 = vld [vmem:[#allocation5] sm:$0xf]  ;;  %157 = vmatpush.bf16.msra.mxu0 %v768_v3  ;;  %v780_v12 = vor.u32 %v1047_v9, %v777_v10  ;;  %v1044_v13 = vld [vmem:[#allocation5 + $0xc] sm:$0xf0]  ;;  %v1042_v14 = vld [vmem:[#allocation5 + $0x4] sm:$0xf] }
  0x17   :  { %v753_v15 = vld [vmem:[#allocation5 + $0x10] sm:$0xf0]  ;;  %170 = vmatpush.bf16.msra.mxu1 %v772_v7  ;;  %v752_v16 = vor.u32 %v1044_v13, %v751_v11  ;;  %v759_v18 = vld [vmem:[#allocation5 + $0x8] sm:$0xf]  ;;  %v1045_v19 = vld [vmem:[#allocation5 + $0x14] sm:$0xf0] }
  0x18   :  { %183 = vmatpush.bf16.msra.mxu2 %v776_v8  ;;  %v756_v17 = vor.u32 %v1042_v14, %v753_v15  ;;  %v1043_v20 = vld [vmem:[#allocation5 + $0xc] sm:$0xf]  ;;  %196 = vmatpush.bf16.msra.mxu3 %v780_v12  ;;  %v760_v21 = vor.u32 %v1045_v19, %v759_v18  ;;  %v761_v22 = vld [vmem:[#allocation5 + $0x18] sm:$0xf0]  ;;  %vm147_vm0 = vcmask 261120   ;;  %vm740_vm4 = vcmask 7168  }
  0x19   :  { %v87_v23 = vld [vmem:[#allocation3] sm:$0xff]  ;;  %v843_v24 = vld [vmem:[#allocation8 + $0x70] sm:$0xf]  ;;  %v764_v25 = vor.u32 %v1043_v20, %v761_v22  ;;  %v835_v32 = vld [vmem:[#allocation8 + $0x60] sm:$0xf] }
  0x1a   :  { %v88_v26 = vpack.c.bf16 %v87_v23, %v87_v23  ;;  %v1065_v27 = vld [vmem:[#allocation8 + $0x74] sm:$0xf0]  ;;  %v907_v28 = vld [vmem:[#allocation8 + $0xf0] sm:$0xf]  ;;  %158 = vmatpush.bf16.msra.mxu0 %v752_v16  ;;  %v1063_v33 = vld [vmem:[#allocation8 + $0x64] sm:$0xf0] }
  0x1b   :  { %v1081_v29 = vld [vmem:[#allocation8 + $0xf4] sm:$0xf0]  ;;  %v844_v30 = vor.u32 %v1065_v27, %v843_v24  ;;  %v899_v34 = vld [vmem:[#allocation8 + $0xe0] sm:$0xf]  ;;  %171 = vmatpush.bf16.msra.mxu1 %v756_v17  ;;  %v1079_v35 = vld [vmem:[#allocation8 + $0xe4] sm:$0xf0]  ;;  %v836_v38 = vor.u32 %v1063_v33, %v835_v32 }
  0x1c   :  { %v908_v31 = vor.u32 %v1081_v29, %v907_v28  ;;  %184 = vmatpush.bf16.msra.mxu2 %v760_v21  ;;  %v971_v36 = vld [vmem:[#allocation8 + $0x170] sm:$0xf]  ;;  %v1097_v37 = vld [vmem:[#allocation8 + $0x174] sm:$0xf0]  ;;  %197 = vmatpush.bf16.msra.mxu3 %v764_v25  ;;  %v900_v43 = vor.u32 %v1079_v35, %v899_v34  ;;  %v963_v48 = vld [vmem:[#allocation8 + $0x160] sm:$0xf] }
  0x1d   :  { %v972_v39 = vor.u32 %v1097_v37, %v971_v36  ;;  %v1035_v40 = vld [vmem:[#allocation8 + $0x1f0] sm:$0xf]  ;;  %v1113_v41 = vld [vmem:[#allocation8 + $0x1f4] sm:$0xf0]  ;;  %781 = vmatmul.msk.bf16.vlgmr.msra.gmra.mxu0 %vm147_vm0, %v88_v26  ;;  %v1095_v49 = vld [vmem:[#allocation8 + $0x164] sm:$0xf0] }
  0x1e   :  { %601 = vmatpush.bf16.msrb.mxu0 %v844_v30  ;;  %v827_v42 = vld [vmem:[#allocation8 + $0x50] sm:$0xf]  ;;  %v1036_v44 = vor.u32 %v1113_v41, %v1035_v40  ;;  %v1061_v45 = vld [vmem:[#allocation8 + $0x54] sm:$0xf0]  ;;  %782 = vmatmul.msk.bf16.vlgmr.msra.gmra.mxu1 %vm147_vm0, %v88_v26  ;;  %v1027_v50 = vld [vmem:[#allocation8 + $0x1e0] sm:$0xf]  ;;  %v964_v51 = vor.u32 %v1095_v49, %v963_v48 }
  0x1f   :  { %614 = vmatpush.bf16.msrb.mxu1 %v908_v31  ;;  %v891_v46 = vld [vmem:[#allocation8 + $0xd0] sm:$0xf]  ;;  %v1077_v47 = vld [vmem:[#allocation8 + $0xd4] sm:$0xf0]  ;;  %783 = vmatmul.msk.bf16.vlgmr.msra.gmra.mxu2 %vm147_vm0, %v88_v26  ;;  %v1111_v52 = vld [vmem:[#allocation8 + $0x1e4] sm:$0xf0]  ;;  %v828_v53 = vor.u32 %v1061_v45, %v827_v42 }
  0x20   :  { %784 = vmatmul.msk.bf16.vlgmr.msra.gmra.mxu3 %vm147_vm0, %v88_v26  ;;  %627 = vmatpush.bf16.msrb.mxu2 %v972_v39  ;;  %v1028_v54 = vor.u32 %v1111_v52, %v1027_v50  ;;  %v819_v55 = vld [vmem:[#allocation8 + $0x40] sm:$0xf]  ;;  %v1059_v56 = vld [vmem:[#allocation8 + $0x44] sm:$0xf0]  ;;  %v955_v57 = vld [vmem:[#allocation8 + $0x150] sm:$0xf]  ;;  %v892_v58 = vor.u32 %v1077_v47, %v891_v46 }
  0x21   :  { %640 = vmatpush.bf16.msrb.mxu3 %v1036_v44  ;;  %v1093_v59 = vld [vmem:[#allocation8 + $0x154] sm:$0xf0]  ;;  %v1019_v60 = vld [vmem:[#allocation8 + $0x1d0] sm:$0xf]  ;;  %v883_v62 = vld [vmem:[#allocation8 + $0xc0] sm:$0xf]  ;;  %v820_v1 = vor.u32 %v1059_v56, %v819_v55 }
  0x22   :  { %602 = vmatpush.bf16.msrb.mxu0 %v836_v38  ;;  %v1109_v61 = vld [vmem:[#allocation8 + $0x1d4] sm:$0xf0]  ;;  %v1075_v63 = vld [vmem:[#allocation8 + $0xc4] sm:$0xf0]  ;;  %v956_v0 = vor.u32 %v1093_v59, %v955_v57  ;;  %v811_v3 = vld [vmem:[#allocation8 + $0x30] sm:$0xf] }
  0x23   :  { %615 = vmatpush.bf16.msrb.mxu1 %v900_v43  ;;  %v1020_v2 = vor.u32 %v1109_v61, %v1019_v60  ;;  %v947_v4 = vld [vmem:[#allocation8 + $0x140] sm:$0xf]  ;;  %v1091_v5 = vld [vmem:[#allocation8 + $0x144] sm:$0xf0]  ;;  %v884_v6 = vor.u32 %v1075_v63, %v883_v62  ;;  %v1057_v7 = vld [vmem:[#allocation8 + $0x34] sm:$0xf0] }
  0x24   :  { %628 = vmatpush.bf16.msrb.mxu2 %v964_v51  ;;  %v1011_v8 = vld [vmem:[#allocation8 + $0x1c0] sm:$0xf]  ;;  %v1107_v9 = vld [vmem:[#allocation8 + $0x1c4] sm:$0xf0]  ;;  %v875_v10 = vld [vmem:[#allocation8 + $0xb0] sm:$0xf]  ;;  %v948_v12 = vor.u32 %v1091_v5, %v947_v4  ;;  %v812_v13 = vor.u32 %v1057_v7, %v811_v3 }
  0x25   :  { %641 = vmatpush.bf16.msrb.mxu3 %v1028_v54  ;;  %v1073_v11 = vld [vmem:[#allocation8 + $0xb4] sm:$0xf0]  ;;  %v1012_v14 = vor.u32 %v1107_v9, %v1011_v8  ;;  %v803_v15 = vld [vmem:[#allocation8 + $0x20] sm:$0xf]  ;;  %v939_v16 = vld [vmem:[#allocation8 + $0x130] sm:$0xf] }
  0x26   :  { %603 = vmatpush.bf16.msrb.mxu0 %v828_v53  ;;  %v1089_v17 = vld [vmem:[#allocation8 + $0x134] sm:$0xf0]  ;;  %v876_v18 = vor.u32 %v1073_v11, %v875_v10  ;;  %v1055_v19 = vld [vmem:[#allocation8 + $0x24] sm:$0xf0]  ;;  %v1003_v20 = vld [vmem:[#allocation8 + $0x1b0] sm:$0xf] }
  0x27   :  { %616 = vmatpush.bf16.msrb.mxu1 %v892_v58  ;;  %v1105_v21 = vld [vmem:[#allocation8 + $0x1b4] sm:$0xf0]  ;;  %v867_v22 = vld [vmem:[#allocation8 + $0xa0] sm:$0xf]  ;;  %v1071_v23 = vld [vmem:[#allocation8 + $0xa4] sm:$0xf0]  ;;  %v940_v24 = vor.u32 %v1089_v17, %v939_v16  ;;  %v804_v25 = vor.u32 %v1055_v19, %v803_v15 }
  0x28   :  { %629 = vmatpush.bf16.msrb.mxu2 %v956_v0  ;;  %v1004_v26 = vor.u32 %v1105_v21, %v1003_v20  ;;  %v795_v27 = vld [vmem:[#allocation8 + $0x10] sm:$0xf]  ;;  %v931_v28 = vld [vmem:[#allocation8 + $0x120] sm:$0xf]  ;;  %v1087_v29 = vld [vmem:[#allocation8 + $0x124] sm:$0xf0]  ;;  %v868_v30 = vor.u32 %v1071_v23, %v867_v22 }
  0x29   :  { %642 = vmatpush.bf16.msrb.mxu3 %v1020_v2  ;;  %v1053_v31 = vld [vmem:[#allocation8 + $0x14] sm:$0xf0]  ;;  %v995_v32 = vld [vmem:[#allocation8 + $0x1a0] sm:$0xf]  ;;  %v1103_v33 = vld [vmem:[#allocation8 + $0x1a4] sm:$0xf0]  ;;  %v932_v36 = vor.u32 %v1087_v29, %v931_v28 }
  0x2a   :  { %604 = vmatpush.bf16.msrb.mxu0 %v820_v1  ;;  %v859_v34 = vld [vmem:[#allocation8 + $0x90] sm:$0xf]  ;;  %v1069_v35 = vld [vmem:[#allocation8 + $0x94] sm:$0xf0]  ;;  %v787_v37 = vld [vmem:[#allocation8] sm:$0xf]  ;;  %v796_v38 = vor.u32 %v1053_v31, %v795_v27  ;;  %v996_v39 = vor.u32 %v1103_v33, %v995_v32 }
  0x2b   :  { %617 = vmatpush.bf16.msrb.mxu1 %v884_v6  ;;  %v1051_v40 = vld [vmem:[#allocation8 + $0x4] sm:$0xf0]  ;;  %v923_v41 = vld [vmem:[#allocation8 + $0x110] sm:$0xf]  ;;  %v1085_v42 = vld [vmem:[#allocation8 + $0x114] sm:$0xf0]  ;;  %v860_v43 = vor.u32 %v1069_v35, %v859_v34 }
  0x2c   :  { %630 = vmatpush.bf16.msrb.mxu2 %v948_v12  ;;  %v851_v44 = vld [vmem:[#allocation8 + $0x80] sm:$0xf]  ;;  %v987_v45 = vld [vmem:[#allocation8 + $0x190] sm:$0xf]  ;;  %v1101_v46 = vld [vmem:[#allocation8 + $0x194] sm:$0xf0]  ;;  %v924_v52 = vor.u32 %v1085_v42, %v923_v41  ;;  %v788_v53 = vor.u32 %v1051_v40, %v787_v37 }
  0x2d   :  { %643 = vmatpush.bf16.msrb.mxu3 %v1012_v14  ;;  %v1067_v47 = vld [vmem:[#allocation8 + $0x84] sm:$0xf0]  ;;  %v1064_v48 = vld [vmem:[#allocation8 + $0x74] sm:$0xf]  ;;  %v845_v49 = vld [vmem:[#allocation8 + $0x78] sm:$0xf0]  ;;  %v988_v54 = vor.u32 %v1101_v46, %v987_v45 }
  0x2e   :  { %605 = vmatpush.bf16.msrb.mxu0 %v812_v13  ;;  %v1080_v50 = vld [vmem:[#allocation8 + $0xf4] sm:$0xf]  ;;  %v909_v51 = vld [vmem:[#allocation8 + $0xf8] sm:$0xf0]  ;;  %v1062_v55 = vld [vmem:[#allocation8 + $0x64] sm:$0xf]  ;;  %v852_v59 = vor.u32 %v1067_v47, %v851_v44  ;;  %v848_v60 = vor.u32 %v1064_v48, %v845_v49 }
  0x2f   :  { %618 = vmatpush.bf16.msrb.mxu1 %v876_v18  ;;  %v915_v56 = vld [vmem:[#allocation8 + $0x100] sm:$0xf]  ;;  %v1083_v57 = vld [vmem:[#allocation8 + $0x104] sm:$0xf0]  ;;  %v1096_v62 = vld [vmem:[#allocation8 + $0x174] sm:$0xf]  ;;  %v912_v0 = vor.u32 %v1080_v50, %v909_v51 }
  0x30   :  { %631 = vmatpush.bf16.msrb.mxu2 %v940_v24  ;;  %v979_v58 = vld [vmem:[#allocation8 + $0x180] sm:$0xf]  ;;  %v1099_v61 = vld [vmem:[#allocation8 + $0x184] sm:$0xf0]  ;;  %v973_v63 = vld [vmem:[#allocation8 + $0x178] sm:$0xf0]  ;;  %v916_v6 = vor.u32 %v1083_v57, %v915_v56 }
  0x31   :  { %644 = vmatpush.bf16.msrb.mxu3 %v1004_v26  ;;  %v837_v1 = vld [vmem:[#allocation8 + $0x68] sm:$0xf0]  ;;  %v1112_v2 = vld [vmem:[#allocation8 + $0x1f4] sm:$0xf]  ;;  %v1037_v3 = vld [vmem:[#allocation8 + $0x1f8] sm:$0xf0]  ;;  %v980_v7 = vor.u32 %v1099_v61, %v979_v58  ;;  %v976_v8 = vor.u32 %v1096_v62, %v973_v63 }
  0x32   :  { %606 = vmatpush.bf16.msrb.mxu0 %v804_v25  ;;  %v1078_v4 = vld [vmem:[#allocation8 + $0xe4] sm:$0xf]  ;;  %v901_v5 = vld [vmem:[#allocation8 + $0xe8] sm:$0xf0]  ;;  %v840_v9 = vor.u32 %v1062_v55, %v837_v1  ;;  %v1040_v10 = vor.u32 %v1112_v2, %v1037_v3  ;;  %v1060_v12 = vld [vmem:[#allocation8 + $0x54] sm:$0xf] }
  0x33   :  { %619 = vmatpush.bf16.msrb.mxu1 %v868_v30  ;;  %v904_v11 = vor.u32 %v1078_v4, %v901_v5  ;;  %v829_v13 = vld [vmem:[#allocation8 + $0x58] sm:$0xf0]  ;;  %v1076_v14 = vld [vmem:[#allocation8 + $0xd4] sm:$0xf]  ;;  %v1094_v18 = vld [vmem:[#allocation8 + $0x164] sm:$0xf] }
  0x34   :  { %632 = vmatpush.bf16.msrb.mxu2 %v932_v36  ;;  %v832_v15 = vor.u32 %v1060_v12, %v829_v13  ;;  %v893_v16 = vld [vmem:[#allocation8 + $0xd8] sm:$0xf0]  ;;  %v965_v19 = vld [vmem:[#allocation8 + $0x168] sm:$0xf0]  ;;  %v1110_v21 = vld [vmem:[#allocation8 + $0x1e4] sm:$0xf] }
  0x35   :  { %645 = vmatpush.bf16.msrb.mxu3 %v996_v39  ;;  %v896_v17 = vor.u32 %v1076_v14, %v893_v16  ;;  %v968_v20 = vor.u32 %v1094_v18, %v965_v19  ;;  %v1029_v22 = vld [vmem:[#allocation8 + $0x1e8] sm:$0xf0]  ;;  %v1058_v24 = vld [vmem:[#allocation8 + $0x44] sm:$0xf]  ;;  %v1092_v30 = vld [vmem:[#allocation8 + $0x154] sm:$0xf] }
  0x36   :  { %607 = vmatpush.bf16.msrb.mxu0 %v796_v38  ;;  %v1032_v23 = vor.u32 %v1110_v21, %v1029_v22  ;;  %v821_v25 = vld [vmem:[#allocation8 + $0x48] sm:$0xf0]  ;;  %v1074_v26 = vld [vmem:[#allocation8 + $0xc4] sm:$0xf]  ;;  %v957_v31 = vld [vmem:[#allocation8 + $0x158] sm:$0xf0] }
  0x37   :  { %620 = vmatpush.bf16.msrb.mxu1 %v860_v43  ;;  %v824_v27 = vor.u32 %v1058_v24, %v821_v25  ;;  %v885_v28 = vld [vmem:[#allocation8 + $0xc8] sm:$0xf0]  ;;  %v1108_v32 = vld [vmem:[#allocation8 + $0x1d4] sm:$0xf]  ;;  %v960_v33 = vor.u32 %v1092_v30, %v957_v31  ;;  %v1021_v34 = vld [vmem:[#allocation8 + $0x1d8] sm:$0xf0] }
  0x38   :  { %633 = vmatpush.bf16.msrb.mxu2 %v924_v52  ;;  %v888_v29 = vor.u32 %v1074_v26, %v885_v28  ;;  %v1024_v35 = vor.u32 %v1108_v32, %v1021_v34  ;;  %v1056_v36 = vld [vmem:[#allocation8 + $0x34] sm:$0xf]  ;;  %v813_v37 = vld [vmem:[#allocation8 + $0x38] sm:$0xf0]  ;;  %v1090_v42 = vld [vmem:[#allocation8 + $0x144] sm:$0xf] }
  0x39   :  { %646 = vmatpush.bf16.msrb.mxu3 %v988_v54  ;;  %v816_v38 = vor.u32 %v1056_v36, %v813_v37  ;;  %v1072_v39 = vld [vmem:[#allocation8 + $0xb4] sm:$0xf]  ;;  %v877_v40 = vld [vmem:[#allocation8 + $0xb8] sm:$0xf0]  ;;  %v949_v43 = vld [vmem:[#allocation8 + $0x148] sm:$0xf0] }
  0x3a   :  { %608 = vmatpush.bf16.msrb.mxu0 %v788_v53  ;;  %v880_v41 = vor.u32 %v1072_v39, %v877_v40  ;;  %v1106_v44 = vld [vmem:[#allocation8 + $0x1c4] sm:$0xf]  ;;  %v952_v45 = vor.u32 %v1090_v42, %v949_v43  ;;  %v1013_v46 = vld [vmem:[#allocation8 + $0x1c8] sm:$0xf0]  ;;  %v1088_v54 = vld [vmem:[#allocation8 + $0x134] sm:$0xf] }
  0x3b   :  { %621 = vmatpush.bf16.msrb.mxu1 %v852_v59  ;;  %v1016_v47 = vor.u32 %v1106_v44, %v1013_v46  ;;  %v1054_v48 = vld [vmem:[#allocation8 + $0x24] sm:$0xf]  ;;  %v805_v49 = vld [vmem:[#allocation8 + $0x28] sm:$0xf0]  ;;  %v941_v55 = vld [vmem:[#allocation8 + $0x138] sm:$0xf0] }
  0x3c   :  { %634 = vmatpush.bf16.msrb.mxu2 %v916_v6  ;;  %v1070_v50 = vld [vmem:[#allocation8 + $0xa4] sm:$0xf]  ;;  %v808_v51 = vor.u32 %v1054_v48, %v805_v49  ;;  %v869_v52 = vld [vmem:[#allocation8 + $0xa8] sm:$0xf0]  ;;  %v1104_v56 = vld [vmem:[#allocation8 + $0x1b4] sm:$0xf]  ;;  %v944_v57 = vor.u32 %v1088_v54, %v941_v55 }
  0x3d   :  { %647 = vmatpush.bf16.msrb.mxu3 %v980_v7  ;;  %v872_v53 = vor.u32 %v1070_v50, %v869_v52  ;;  %v1005_v58 = vld [vmem:[#allocation8 + $0x1b8] sm:$0xf0]  ;;  %v1068_v62 = vld [vmem:[#allocation8 + $0x94] sm:$0xf]  ;;  %v1086_v1 = vld [vmem:[#allocation8 + $0x124] sm:$0xf] }
  0x3e   :  { %653 = vmatpush.bf16.msra.mxu0 %v848_v60  ;;  %v1008_v59 = vor.u32 %v1104_v56, %v1005_v58  ;;  %v1052_v60 = vld [vmem:[#allocation8 + $0x14] sm:$0xf]  ;;  %v797_v61 = vld [vmem:[#allocation8 + $0x18] sm:$0xf0]  ;;  %v933_v2 = vld [vmem:[#allocation8 + $0x128] sm:$0xf0] }
  0x3f   :  { %666 = vmatpush.bf16.msra.mxu1 %v912_v0  ;;  %v800_v63 = vor.u32 %v1052_v60, %v797_v61  ;;  %v861_v0 = vld [vmem:[#allocation8 + $0x98] sm:$0xf0]  ;;  %v936_v4 = vor.u32 %v1086_v1, %v933_v2  ;;  %v1102_v5 = vld [vmem:[#allocation8 + $0x1a4] sm:$0xf]  ;;  %v997_v6 = vld [vmem:[#allocation8 + $0x1a8] sm:$0xf0] }
  0x40   :  { %679 = vmatpush.bf16.msra.mxu2 %v976_v8  ;;  %v864_v3 = vor.u32 %v1068_v62, %v861_v0  ;;  %v1050_v7 = vld [vmem:[#allocation8 + $0x4] sm:$0xf]  ;;  %v1000_v8 = vor.u32 %v1102_v5, %v997_v6  ;;  %v1084_v14 = vld [vmem:[#allocation8 + $0x114] sm:$0xf]  ;;  %v989_v18 = vld [vmem:[#allocation8 + $0x198] sm:$0xf0] }
  0x41   :  { %692 = vmatpush.bf16.msra.mxu3 %v1040_v10  ;;  %v1066_v10 = vld [vmem:[#allocation8 + $0x84] sm:$0xf]  ;;  %v1100_v16 = vld [vmem:[#allocation8 + $0x194] sm:$0xf]  ;;  %v917_v21 = vld [vmem:[#allocation8 + $0x108] sm:$0xf0] }
  0x42   :  { %654 = vmatpush.bf16.msra.mxu0 %v840_v9  ;;  %v789_v9 = vld [vmem:[#allocation8 + $0x8] sm:$0xf0]  ;;  %v992_v19 = vor.u32 %v1100_v16, %v989_v18  ;;  %v1098_v22 = vld [vmem:[#allocation8 + $0x184] sm:$0xf]  ;;  %v97_v25 = vld [vmem:[#allocation7] sm:$0xf] }
  0x43   :  { %667 = vmatpush.bf16.msra.mxu1 %v904_v11  ;;  %v853_v11 = vld [vmem:[#allocation8 + $0x88] sm:$0xf0]  ;;  %v792_v12 = vor.u32 %v1050_v7, %v789_v9  ;;  %v100_v28 = vperm.slane %v97_v25, 1  ;;  %v102_v37 = vperm.slane %v97_v25, 3  ;;  %v275_v54 = vld [vmem:[%s1308_s4] sm:$0x3] }
  0x44   :  { %680 = vmatpush.bf16.msra.mxu2 %v968_v20  ;;  %v856_v13 = vor.u32 %v1066_v10, %v853_v11  ;;  %v1082_v20 = vld [vmem:[#allocation8 + $0x104] sm:$0xf]  ;;  %v981_v24 = vld [vmem:[#allocation8 + $0x188] sm:$0xf0]  ;;  %v277_v56 = vperm.slane %v275_v54, 0 }
  0x45   :  { %693 = vmatpush.bf16.msra.mxu3 %v1032_v23  ;;  %v920_v23 = vor.u32 %v1082_v20, %v917_v21  ;;  %v984_v26 = vor.u32 %v1098_v22, %v981_v24  ;;  %v707_v9 = vld [vmem:[%s1309_s5] sm:$0x3]  ;;  %v719_v22 = vstv %s1310_s6 }
  0x46   :  { %655 = vmatpush.bf16.msra.mxu0 %v832_v15  ;;  %v925_v15 = vld [vmem:[#allocation8 + $0x118] sm:$0xf0] }
  0x47   :  { %668 = vmatpush.bf16.msra.mxu1 %v896_v17  ;;  %v928_v17 = vor.u32 %v1084_v14, %v925_v15  ;;  %v709_v14 = vperm.slane %v707_v9, 0  ;;  %v710_v15 = vperm.slane %v707_v9, 1 }
  0x48   :  { %681 = vmatpush.bf16.msra.mxu2 %v960_v33 }
  0x49   :  { %694 = vmatpush.bf16.msra.mxu3 %v1024_v35  ;;  %v101_v35 = vperm.slane %v97_v25, 2 }
  0x4a   :  { %656 = vmatpush.bf16.msra.mxu0 %v824_v27  ;;  %v99_v27 = vperm.slane %v97_v25, 0 }
  0x4b   :  { %669 = vmatpush.bf16.msra.mxu1 %v888_v29 }
  0x4c   :  { %682 = vmatpush.bf16.msra.mxu2 %v952_v45 }
  0x4d   :  { %695 = vmatpush.bf16.msra.mxu3 %v1016_v47 }
  0x4e   :  { %657 = vmatpush.bf16.msra.mxu0 %v816_v38 }
  0x4f   :  { %670 = vmatpush.bf16.msra.mxu1 %v880_v41 }
  0x50   :  { %683 = vmatpush.bf16.msra.mxu2 %v944_v57 }
  0x51   :  { %696 = vmatpush.bf16.msra.mxu3 %v1008_v59 }
  0x52   :  { %658 = vmatpush.bf16.msra.mxu0 %v808_v51 }
  0x53   :  { %671 = vmatpush.bf16.msra.mxu1 %v872_v53 }
  0x54   :  { %684 = vmatpush.bf16.msra.mxu2 %v936_v4 }
  0x55   :  { %697 = vmatpush.bf16.msra.mxu3 %v1000_v8 }
  0x56   :  { %659 = vmatpush.bf16.msra.mxu0 %v800_v63  ;;  %v278_v63 = vperm.slane %v275_v54, 1 }
  0x57   :  { %672 = vmatpush.bf16.msra.mxu1 %v864_v3 }
  0x58   :  { %685 = vmatpush.bf16.msra.mxu2 %v928_v17 }
  0x59   :  { %698 = vmatpush.bf16.msra.mxu3 %v992_v19 }
  0x5a   :  { %660 = vmatpush.bf16.msra.mxu0 %v792_v12 }
  0x5b   :  { %673 = vmatpush.bf16.msra.mxu1 %v856_v13 }
  0x5c   :  { %686 = vmatpush.bf16.msra.mxu2 %v920_v23 }
  0x5d   :  { %699 = vmatpush.bf16.msra.mxu3 %v984_v26 }
  0x9a   :  { %v160_v29 = vpop.f32.mrf.mxu0 }
  0x9b   :  { %v161_v30 = vadd.f32 %v160_v29, %v99_v27  ;;  %v173_v31 = vpop.f32.mrf.mxu1 }
  0x9c   :  { %v174_v32 = vadd.f32 %v173_v31, %v100_v28 }
  0x9d   :  { %v203_v33 = vmax.f32 %v161_v30, 0.0 }
  0x9e   :  { %v204_v34 = vmax.f32 %v174_v32, 0.0 }
  0x9f   :  { %v207_v36 = vpack.c.bf16 %v203_v33, %v203_v33 }
  0xa0   :  { %v208_v38 = vpack.c.bf16 %v204_v34, %v204_v34 }
  0xa1   :  { %609 = vmatmul.bf16.vlgmr.msrb.gmra.mxu0 %v207_v36 }
  0xa2   :  { %v186_v39 = vpop.f32.mrf.mxu2  ;;  %622 = vmatmul.bf16.vlgmr.msrb.gmra.mxu1 %v208_v38  ;;  %v162_v42 = vpop.f32.mrf.mxu0 }
  0xa3   :  { %v187_v40 = vadd.f32 %v186_v39, %v101_v35  ;;  %v199_v41 = vpop.f32.mrf.mxu3  ;;  %v175_v44 = vpop.f32.mrf.mxu1 }
  0xa4   :  { %v200_v43 = vadd.f32 %v199_v41, %v102_v37 }
  0xa5   :  { %v205_v45 = vmax.f32 %v187_v40, 0.0 }
  0xa6   :  { %v206_v46 = vmax.f32 %v200_v43, 0.0 }
  0xa7   :  { %v209_v47 = vpack.c.bf16 %v205_v45, %v205_v45 }
  0xa8   :  { %v210_v48 = vpack.c.bf16 %v206_v46, %v206_v46 }
  0xa9   :  { %635 = vmatmul.bf16.vlgmr.msrb.gmra.mxu2 %v209_v47 }
  0xaa   :  { %648 = vmatmul.bf16.vlgmr.msrb.gmra.mxu3 %v210_v48  ;;  %v188_v49 = vpop.f32.mrf.mxu2 }
  0xab   :  { %v201_v50 = vpop.f32.mrf.mxu3 }
  0xb1   :  { %661 = vmatmul.bf16.vlgmr.msra.gmra.mxu0 %v207_v36 }
  0xb2   :  { %674 = vmatmul.bf16.vlgmr.msra.gmra.mxu1 %v208_v38 }
  0xb9   :  { %687 = vmatmul.bf16.vlgmr.msra.gmra.mxu2 %v209_v47 }
  0xba   :  { %700 = vmatmul.bf16.vlgmr.msra.gmra.mxu3 %v210_v48 }
 0x11e   :  { %v610_v51 = vpop.f32.mrf.mxu0 }
 0x11f   :  { %v623_v52 = vpop.f32.mrf.mxu1  ;;  %v611_v59 = vadd.f32 %v610_v51, %v277_v56 }
 0x121   :  { %v624_v62 = vadd.f32 %v623_v52, %v611_v59 }
 0x126   :  { %v612_v53 = vpop.f32.mrf.mxu0 }
 0x127   :  { %v625_v55 = vpop.f32.mrf.mxu1 }
 0x12c   :  { %v636_v57 = vpop.f32.mrf.mxu2 }
 0x12d   :  { %v649_v58 = vpop.f32.mrf.mxu3  ;;  %v637_v2 = vadd.f32 %v636_v57, %v624_v62 }
 0x12e   :  { %v662_v60 = vpop.f32.mrf.mxu0 }
 0x12f   :  { %v675_v61 = vpop.f32.mrf.mxu1  ;;  %v663_v3 = vadd.f32 %v662_v60, %v278_v63  ;;  %v650_v6 = vadd.f32 %v649_v58, %v637_v2 }
 0x131   :  { %v676_v7 = vadd.f32 %v675_v61, %v663_v3  ;;  %v705_v12 = vmax.f32 %v650_v6, 0.0 }
 0x133   :  { %v713_v17 = vmul.f32 %v709_v14, %v705_v12 }
 0x134   :  { %v638_v0 = vpop.f32.mrf.mxu2 }
 0x135   :  { %v651_v1 = vpop.f32.mrf.mxu3 }
 0x136   :  { %v664_v4 = vpop.f32.mrf.mxu0 }
 0x137   :  { %v677_v5 = vpop.f32.mrf.mxu1 }
 0x13c   :  { %v688_v8 = vpop.f32.mrf.mxu2 }
 0x13d   :  { %v689_v10 = vadd.f32 %v688_v8, %v676_v7  ;;  %v701_v11 = vpop.f32.mrf.mxu3 }
 0x13f   :  { %v702_v13 = vadd.f32 %v701_v11, %v689_v10 }
 0x141   :  { %v706_v16 = vmax.f32 %v702_v13, 0.0 }
 0x143   :  { %v714_v18 = vmul.f32 %v710_v15, %v706_v16 }
 0x144   :  { %v690_v19 = vpop.f32.mrf.mxu2 }
 0x145   :  { %v703_v20 = vpop.f32.mrf.mxu3  ;;  %v715_v21 = vadd.f32 %v714_v18, %v713_v17 }
 0x147   :  { %716 = vadd.xlane.f32.xlu0 %v715_v21 }
 0x1ba   :  { %v717_v23 = vpop.xlane.xlu0 %716 }
 0x1bb   :  { %v720_v24 = vadd.f32 %v719_v22, %v717_v23 }
 0x1bd   :  { %v1041_v25 = vmul.f32 -1.442695, %v720_v24 }
 0x1bf   :  { %1122 = vpow2.f32 %v1041_v25 }
 0x1c5   :  { %v1123_v26 = vpop.eup %1122 }
 0x1c6   :  { %v724_v27 = vadd.f32 1.0, %v1123_v26 }
 0x1c8   :  { %1124 = vrcp.f32 %v724_v27  ;;  %v736_v31 = vand.u32 2147483648, %v724_v27  ;;  %v734_v33 = vand.u32 2147483647, %v724_v27  ;;  %vm730_vm2 = vweird.f32 %v724_v27 }
 0x1ca   :  { %v737_v35 = vor.u32 1.1754944e-38, %v736_v31  ;;  %vm735_vm5 = vcmp.eq.f32.partialorder %v734_v33, 8.507059e+37 }
 0x1ce   :  { %v1125_v28 = vpop.eup %1124 }
 0x1cf   :  { %v726_v29 = vmul.f32 %v1125_v28, %v724_v27  ;;  %vm731_vm1 = vweird.f32 %v1125_v28 }
 0x1d0   :  { %vm732_vm3 = vmor %vm730_vm2, %vm731_vm1 }
 0x1d1   :  { %v727_v30 = vsub.f32 1.0, %v726_v29 }
 0x1d3   :  { %v728_v32 = vmul.f32 %v1125_v28, %v727_v30 }
 0x1d5   :  { %v729_v34 = vadd.f32 %v1125_v28, %v728_v32 }
 0x1d7   :  { %v733_v36 = vsel %vm732_vm3, %v1125_v28, %v729_v34 }
 0x1d8   :  { %v738_v37 = vsel %vm735_vm5, %v737_v35, %v733_v36 }
 0x1d9   :  { %741 = vst.msk [vmem:[%s1311_s7] sm:$0xff] %vm740_vm4, %v738_v37 }
 0x1da   :  { %746 = vsyncpa [#allocation4], 1 }
 0x1db   :  { %747 = vsyncpa [#allocation6], 1 }
 0x1dc   :  { %748 = vsyncpa [#allocation9], 1 }

</bundles_post_ra>
